<compile_context>
chip_gen: v7x
topology: tpu7x:2x2x1
jax: 0.10.0
libtpu: 0.0.40
codegen_flags: <defaults>
</compile_context>

<pallas_src>
import jax
import jax.numpy as jnp
from jax.experimental import pallas as pl
from jax.experimental.pallas import tpu as pltpu

_MIB = 1024 * 1024
_MATMUL_PRECISION = jax.lax.Precision.DEFAULT  # explicit: no accidental HIGHEST


def _round_up(x, m):
    return ((x + m - 1) // m) * m


def _largest_divisor_tile(total, cap, unit):
    """Largest multiple of `unit` that divides `total` and is <= cap (>= unit)."""
    best = unit
    t = unit
    limit = min(total, max(cap, unit))
    while t <= limit:
        if total % t == 0:
            best = t
        t += unit
    return best


def _vmem_budget():
    """Returns (physical VMEM bytes/core, vmem_limit_bytes to request, tile cap)."""
    phys = 64 * _MIB                         # conservative default (v7x / unknown)
    try:
        info = pltpu.get_tpu_info()
        cap = getattr(info, "vmem_capacity_bytes", None)
        if cap:
            phys = int(cap)
    except Exception:
        pass
    # ~3/4 of physical, capped at 96 MiB -> 96 MiB on v5e/v6e, ~48 MiB on v7x.
    limit = min((phys * 3) // 4, 96 * _MIB)
    tile_cap = 1024 if phys >= 100 * _MIB else 512
    return phys, int(limit), tile_cap


# ----------------------------------------------------------------------------
# Kernels
# ----------------------------------------------------------------------------
def _affine_fullk_kernel(x_ref, a_ref, t_ref, o_ref):
    """Full-K path: one (tm, tn) output tile = x(tm, D) @ A(D, tn) + t(1, tn)."""
    o_ref[...] = (
        jnp.dot(x_ref[...], a_ref[...],
                preferred_element_type=jnp.float32,
                precision=_MATMUL_PRECISION)
        + t_ref[...].astype(jnp.float32)
    ).astype(o_ref.dtype)


def _affine_ktiled_inplace_kernel(x_ref, a_ref, t_ref, o_ref):
    """K-tiled path, f32 output: accumulate directly into the resident o block."""
    @pl.when(pl.program_id(2) == 0)
    def _init():
        # Fold the bias into the mandatory init -> the "+ t" is free.
        o_ref[...] = jnp.broadcast_to(t_ref[...], o_ref.shape).astype(o_ref.dtype)

    o_ref[...] += jnp.dot(x_ref[...], a_ref[...],
                          preferred_element_type=jnp.float32,
                          precision=_MATMUL_PRECISION).astype(o_ref.dtype)


def _affine_ktiled_scratch_kernel(x_ref, a_ref, t_ref, o_ref, acc_ref):
    """K-tiled path, narrow output: f32 scratch accumulator + final cast."""
    k = pl.program_id(2)

    @pl.when(k == 0)
    def _init():
        acc_ref[...] = jnp.broadcast_to(
            t_ref[...].astype(jnp.float32), acc_ref.shape)

    acc_ref[...] += jnp.dot(x_ref[...], a_ref[...],
                            preferred_element_type=jnp.float32,
                            precision=_MATMUL_PRECISION)

    @pl.when(k == pl.num_programs(2) - 1)
    def _writeback():
        o_ref[...] = acc_ref[...].astype(o_ref.dtype)


# ----------------------------------------------------------------------------
# Wrapper
# ----------------------------------------------------------------------------
def affine_layer(x, affine, translation, *,
                 tm_max=None, tn_max=None, tk_max=None,
                 compute_dtype=None, core_parallel=False, a_buffer_count=2):
    """y = x @ affine + translation, matching torch.matmul(x, A) + t.

    compute_dtype=jnp.bfloat16 halves HBM traffic for A (keeps f32 accumulation)
    but diverges slightly from an f32 reference -> off by default.
    core_parallel=True marks the N grid axis CORE_PARALLEL (v7x 2-TC sharding).
    """
    B, D = x.shape
    assert affine.shape == (D, D)
    assert translation.shape == (D,)

    out_dtype = x.dtype
    _, vmem_limit, auto_cap = _vmem_budget()
    cap_m = tm_max if tm_max is not None else auto_cap
    cap_n = tn_max if tn_max is not None else auto_cap
    cap_k = tk_max if tk_max is not None else auto_cap

    # Padded dims: only the unavoidable (8, 128) rounding; tiles are chosen as
    # divisors of the padded dims so no further padding is ever introduced.
    B_pad = _round_up(B, 8)
    D_pad = _round_up(D, 128)
    tm = _largest_divisor_tile(B_pad, cap_m, 8)
    tn = _largest_divisor_tile(D_pad, cap_n, 128)

    # Optional bf16 operands (f32 accumulation preserved by preferred_element_type).
    if compute_dtype is not None:
        x_c = x.astype(compute_dtype)
        a_c = affine.astype(compute_dtype)
    else:
        x_c, a_c = x, affine
    in_item = jnp.dtype(x_c.dtype).itemsize
    out_item = jnp.dtype(out_dtype).itemsize
    t_item = jnp.dtype(translation.dtype).itemsize

    # Full-K collapse decision: does the double-buffered full-K working set fit
    # within half the requested VMEM limit (headroom for compiler scratch)?
    fullk_live = 2 * in_item * (tm * D_pad + D_pad * tn) + 2 * out_item * tm * tn
    use_fullk = fullk_live <= vmem_limit // 2
    if tk_max is not None and tk_max < D_pad:
        use_fullk = False  # caller explicitly requested K tiling

    # Zero-padding contributes exactly 0 to the dot; padded rows/cols sliced off.
    x_p = x_c if (B_pad == B and D_pad == D) else jnp.pad(
        x_c, ((0, B_pad - B), (0, D_pad - D)))
    a_p = a_c if D_pad == D else jnp.pad(
        a_c, ((0, D_pad - D), (0, D_pad - D)))
    t_p = translation if D_pad == D else jnp.pad(translation, (0, D_pad - D))
    t_p = t_p.reshape(1, D_pad)

    grid_m = B_pad // tm
    grid_n = D_pad // tn
    n_sem = pltpu.CORE_PARALLEL if core_parallel else pltpu.PARALLEL

    def a_spec(shape, index_map):
        if a_buffer_count == 2:
            return pl.BlockSpec(shape, index_map)
        return pl.BlockSpec(shape, index_map,
                            pipeline_mode=pl.Buffered(a_buffer_count))

    if use_fullk:
        grid = (grid_m, grid_n)
        in_specs = [
            pl.BlockSpec((tm, D_pad), lambda i, j: (i, 0)),   # x   (M, K) full-K
            a_spec((D_pad, tn), lambda i, j: (0, j)),         # A   (K, N) full-K
            pl.BlockSpec((1, tn), lambda i, j: (0, j)),       # t   (1, N)
        ]
        out_specs = pl.BlockSpec((tm, tn), lambda i, j: (i, j))
        kernel = _affine_fullk_kernel
        scratch_shapes = ()
        semantics = (pltpu.PARALLEL, n_sem)
        x_passes = 1                                          # x streamed once
    else:
        tk = _largest_divisor_tile(D_pad, cap_k, 128)
        grid = (grid_m, grid_n, D_pad // tk)                  # K innermost
        in_specs = [
            pl.BlockSpec((tm, tk), lambda i, j, k: (i, k)),   # x   (M, K) tile
            a_spec((tk, tn), lambda i, j, k: (k, j)),         # A   (K, N) tile
            pl.BlockSpec((1, tn), lambda i, j, k: (0, j)),    # t   (1, N) tile
        ]
        out_specs = pl.BlockSpec((tm, tn), lambda i, j, k: (i, j))
        if out_dtype == jnp.float32:
            kernel = _affine_ktiled_inplace_kernel            # no scratch needed
            scratch_shapes = ()
        else:
            kernel = _affine_ktiled_scratch_kernel
            scratch_shapes = (pltpu.VMEM((tm, tn), jnp.float32),)
        semantics = (pltpu.PARALLEL, n_sem, pltpu.ARBITRARY)
        x_passes = grid_n                                     # x re-streamed per j

    # Grid-aware HBM-traffic hint: A re-streamed once per M tile, x per N tile.
    cost = pl.CostEstimate(
        flops=2 * B_pad * D_pad * D_pad,
        bytes_accessed=(x_passes * B_pad * D_pad * in_item
                        + grid_m * D_pad * D_pad * in_item
                        + grid_m * D_pad * t_item
                        + B_pad * D_pad * out_item),
        transcendentals=0,
    )

    out = pl.pallas_call(
        kernel,
        out_shape=jax.ShapeDtypeStruct((B_pad, D_pad), out_dtype),
        grid=grid,
        in_specs=in_specs,
        out_specs=out_specs,
        scratch_shapes=scratch_shapes,
        compiler_params=pltpu.CompilerParams(
            dimension_semantics=semantics,
            vmem_limit_bytes=vmem_limit,
        ),
        cost_estimate=cost,
    )(x_p, a_p, t_p)

    return out[:B, :D]


if __name__ == "__main__":
    key = jax.random.PRNGKey(0)
    ks = jax.random.split(key, 9)

    # ---- Case 1: the module's natural (batch, input_dim) shape ----
    batch, input_dim = 8, 32
    x = jax.random.normal(ks[0], (batch, input_dim), dtype=jnp.float32)
    affine = jnp.eye(input_dim, dtype=jnp.float32) \
        + 0.01 * jax.random.normal(ks[1], (input_dim, input_dim), dtype=jnp.float32)
    translation = 0.01 * jax.random.normal(ks[2], (input_dim,), dtype=jnp.float32)

    y = affine_layer(x, affine, translation)
    jax.block_until_ready(y)
    y_ref = jnp.matmul(x, affine) + translation
    assert y.shape == (batch, input_dim)
    assert jnp.allclose(y, y_ref, atol=1e-5, rtol=1e-5), "mismatch vs reference"

    # ---- Case 2: ragged shapes (exercise the 8/128 padding path) ----
    b2, d2 = 5, 20
    x2 = jax.random.normal(ks[3], (b2, d2), dtype=jnp.float32)
    a2 = jnp.eye(d2, dtype=jnp.float32) \
        + 0.01 * jax.random.normal(ks[4], (d2, d2), dtype=jnp.float32)
    t2 = 0.01 * jax.random.normal(ks[5], (d2,), dtype=jnp.float32)

    y2 = affine_layer(x2, a2, t2)
    jax.block_until_ready(y2)
    y2_ref = jnp.matmul(x2, a2) + t2
    assert y2.shape == (b2, d2)
    assert jnp.allclose(y2, y2_ref, atol=1e-5, rtol=1e-5), "ragged mismatch"

    # ---- Case 3: force the K-tiled accumulate-into-output path (tk < D_pad) ----
    b3, d3 = 16, 256
    x3 = jax.random.normal(ks[6], (b3, d3), dtype=jnp.float32)
    a3 = jnp.eye(d3, dtype=jnp.float32) \
        + 0.01 * jax.random.normal(ks[7], (d3, d3), dtype=jnp.float32)
    t3 = 0.01 * jax.random.normal(ks[8], (d3,), dtype=jnp.float32)

    y3 = affine_layer(x3, a3, t3, tn_max=128, tk_max=128)
    jax.block_until_ready(y3)
    y3_ref = jnp.matmul(x3, a3) + t3
    assert y3.shape == (b3, d3)
    assert jnp.allclose(y3, y3_ref, atol=1e-4, rtol=1e-4), "K-tiled mismatch"

    print("KERNEL_OK")
</pallas_src>

<mosaic_0001>
module attributes {stable_mosaic.version = 11 : i64} {
  func.func @_affine_fullk_kernel(%arg0: i32, %arg1: i32, %arg2: memref<8x128xf32, #tpu.memory_space<vmem>>, %arg3: memref<128x128xf32, #tpu.memory_space<vmem>>, %arg4: memref<1x128xf32, #tpu.memory_space<vmem>>, %arg5: memref<8x128xf32, #tpu.memory_space<vmem>>) attributes {dimension_semantics = [#tpu.dimension_semantics<parallel>, #tpu.dimension_semantics<parallel>], iteration_bounds = array<i64: 1, 1>, scalar_prefetch = 0 : i64, scratch_operands = 0 : i64, tpu.core_type = #tpu.core_type<tc>, window_params = [{transform_indices = @transform_0, window_bounds = array<i64: 8, 128>}, {transform_indices = @transform_1, window_bounds = array<i64: 128, 128>}, {transform_indices = @transform_2, window_bounds = array<i64: 1, 128>}, {transform_indices = @transform_3, window_bounds = array<i64: 8, 128>}]} {
    %c0 = arith.constant 0 : index
    %c0_0 = arith.constant 0 : index
    %0 = vector.load %arg2[%c0, %c0_0] : memref<8x128xf32, #tpu.memory_space<vmem>>, vector<8x128xf32>
    %c0_1 = arith.constant 0 : index
    %c0_2 = arith.constant 0 : index
    %1 = vector.load %arg3[%c0_1, %c0_2] : memref<128x128xf32, #tpu.memory_space<vmem>>, vector<128x128xf32>
    %cst = arith.constant dense<0.000000e+00> : vector<8x128xf32>
    %2 = tpu.matmul %0, %1, %cst {dimension_numbers = #tpu.dot_dimension_numbers<[1], [0], [0], [1], [0, 0, 1, 1], [], []>} : vector<8x128xf32>, vector<128x128xf32>, vector<8x128xf32> -> vector<8x128xf32>
    %c0_3 = arith.constant 0 : index
    %c0_4 = arith.constant 0 : index
    %3 = vector.load %arg4[%c0_3, %c0_4] : memref<1x128xf32, #tpu.memory_space<vmem>>, vector<1x128xf32>
    %4 = vector.broadcast %3 : vector<1x128xf32> to vector<8x128xf32>
    %5 = arith.addf %2, %4 : vector<8x128xf32>
    %c0_5 = arith.constant 0 : index
    %c0_6 = arith.constant 0 : index
    %6 = vector.load %arg5[%c0_5, %c0_6] : memref<8x128xf32, #tpu.memory_space<vmem>>, vector<8x128xf32>
    tpu.vector_store %arg5[%c0_5, %c0_6], %5 {strides = array<i32>} : memref<8x128xf32, #tpu.memory_space<vmem>>, vector<8x128xf32>,
    return
  }
  func.func @transform_0(%arg0: i32, %arg1: i32) -> (i32, i32) {
    %c0_i32 = arith.constant 0 : i32
    %c0_i32_0 = arith.constant 0 : i32
    return %arg0, %c0_i32 : i32, i32
  }
  func.func @transform_1(%arg0: i32, %arg1: i32) -> (i32, i32) {
    %c0_i32 = arith.constant 0 : i32
    %c0_i32_0 = arith.constant 0 : i32
    return %c0_i32, %arg1 : i32, i32
  }
  func.func @transform_2(%arg0: i32, %arg1: i32) -> (i32, i32) {
    %c0_i32 = arith.constant 0 : i32
    %c0_i32_0 = arith.constant 0 : i32
    return %c0_i32, %arg1 : i32, i32
  }
  func.func @transform_3(%arg0: i32, %arg1: i32) -> (i32, i32) {
    %c0_i32 = arith.constant 0 : i32
    return %arg0, %arg1 : i32, i32
  }
}

</mosaic_0001>

<bundles_post_ra>
// kernel: tpu_custom_call.1
= control target key start
LH: loop header
LB: loop body
LE: loop exit
PB: predicated region body
PF: predicated region fallthrough
CT: control target
= control target key end

     0   :  { %8 = vsyncpa [#allocation3], 0  ;;  %s383_s0 = inlined_call_operand.hbm [shape: f32[8,128], index: 0, kind: input, shape index: {}]   ;;  %s384_s1 = inlined_call_operand.hbm [shape: f32[128,128], index: 1, kind: input, shape index: {}]   ;;  %s385_s2 = inlined_call_operand.vmem [shape: f32[1,128], index: 2, kind: input, shape index: {}]   ;;  %s386_s3 = inlined_call_operand.hbm [shape: f32[8,128], index: 3, kind: output, shape index: {}]  }
   0x1   :  { %9 = vsyncpa [#allocation6], 0 }
   0x2   :  { %10 = vsyncpa [#allocation4], 0  ;;  %s309_s12 = smov [#allocation2]   ;;  %s310_s14 = smov [#allocation5]  }
   0x3   :  { %s17_s13 = sshll.u32 %s309_s12, 4  ;;  %s26_s15 = sshll.u32 %s310_s14, 4  ;;  %s18_s13 = int_to_ptr.vmem [resolvable:$true] %s17_s13  ;;  %s337_s15 = int_to_ptr.vmem [resolvable:$true] %s26_s15 }
   0x4   :  { %s237_s18 = scalar_lea.hbm %s383_s0, 128 }
   0x5   :  { %p238_p0 = scmp.ne.s32.totalorder %s383_s0, %s237_s18  ;;  %p241_p1 = scmp.lt.u32.totalorder %s237_s18, %s383_s0 }
   0x7   :  { %p243_p2 = pnand %p241_p1, %p238_p0 }
   0x9   :  { %246 = shalt.err (!%p243_p2)
}
   0xa   :  { %s247_s23 = scalar_lea.vmem %s18_s13, 128  ;;  %p252_p4 = scmp.lt.s32.totalorder %s18_s13, %s18_s13 }
   0xb   :  { %p248_p3 = scmp.ne.s32.totalorder %s18_s13, %s247_s23  ;;  %p253_p5 = scmp.lt.s32.totalorder %s247_s23, %s247_s23 }
   0xd   :  { %p254_p6 = por %p253_p5, %p252_p4 }
   0xf   :  { %p255_p7 = pnand %p254_p6, %p248_p3 }
  0x11   :  { %258 = shalt.err (!%p255_p7)
}
  0x12   :  { %20 = dma.hbm_to_vmem [thread:$0]  %s383_s0, 128, %s18_s13, [#allocation3]  }
  0x13   :  { %s259_s28 = scalar_lea.hbm %s384_s1, 2048 }
  0x14   :  { %p260_p8 = scmp.ne.s32.totalorder %s384_s1, %s259_s28  ;;  %p263_p9 = scmp.lt.u32.totalorder %s259_s28, %s384_s1 }
  0x16   :  { %p265_p10 = pnand %p263_p9, %p260_p8 }
  0x18   :  { %268 = shalt.err (!%p265_p10)
}
  0x19   :  { %s269_s6 = scalar_lea.vmem %s337_s15, 2048  ;;  %p274_p12 = scmp.lt.s32.totalorder %s337_s15, %s337_s15 }
  0x1a   :  { %p270_p11 = scmp.ne.s32.totalorder %s337_s15, %s269_s6  ;;  %p275_p13 = scmp.lt.s32.totalorder %s269_s6, %s269_s6 }
  0x1c   :  { %p276_p0 = por %p275_p13, %p274_p12 }
  0x1e   :  { %p277_p1 = pnand %p276_p0, %p270_p11 }
  0x20   :  { %280 = shalt.err (!%p277_p1)
}
  0x21   :  { %s311_s0 = smov 128   ;;  %s312_s7 = smov 8  }
  0x22   :  { %32 = dma.hbm_to_vmem [thread:$0]  %s384_s1, 2048, %s337_s15, [#allocation6], %s311_s0, %s311_s0, %s312_s7  }
  0x23   :  { %303 = dma.done.wait [#allocation3], 128  }
  0x24   :  { %304 = vsyncadd [#allocation3], 4294967168 }
  0x25   :  { %305 = dma.done.wait [#allocation6], 2048  }
  0x26   :  { %306 = vsyncadd [#allocation6], 4294965248  ;;  %v313_v0 = vmov 0.0|0.0   ;;  %vm314_vm0 = vmmov 0   ;;  %v315_v1 = vmov 0.0   ;;  %v42_v2 = vld [vmem:[#allocation5] sm:$0xff] }
  0x27   :  { %205 = vmatprep.subr.bf16.mxu0 %v313_v0  ;;  %202 = vmatprep.mubr.msk.f32.mxu0 %vm314_vm0, %v315_v1  ;;  %v43_v3 = vld [vmem:[#allocation5 + $0x8] sm:$0xff]  ;;  %v44_v4 = vld [vmem:[#allocation5 + $0x10] sm:$0xff]  ;;  %v45_v6 = vld [vmem:[#allocation5 + $0x18] sm:$0xff]  ;;  %s316_s11 = smov [#allocation7]  }
  0x28   :  { %v206_v5 = vpack.c.bf16 %v43_v3, %v42_v2  ;;  %v209_v7 = vpack.c.bf16 %v45_v6, %v44_v4  ;;  %v46_v8 = vld [vmem:[#allocation5 + $0x20] sm:$0xff]  ;;  %v47_v9 = vld [vmem:[#allocation5 + $0x28] sm:$0xff]  ;;  %v48_v11 = vld [vmem:[#allocation5 + $0x30] sm:$0xff]  ;;  %s142_s12 = sshll.u32 %s316_s11, 4  ;;  %s143_s12 = int_to_ptr.vmem [resolvable:$true] %s142_s12 }
  0x29   :  { %v212_v10 = vpack.c.bf16 %v47_v9, %v46_v8  ;;  %v49_v12 = vld [vmem:[#allocation5 + $0x38] sm:$0xff]  ;;  %v50_v14 = vld [vmem:[#allocation5 + $0x40] sm:$0xff]  ;;  %v51_v15 = vld [vmem:[#allocation5 + $0x48] sm:$0xff]  ;;  %s281_s13 = scalar_lea.vmem %s143_s12, 128  ;;  %p286_p3 = scmp.lt.s32.totalorder %s143_s12, %s143_s12 }
  0x2a   :  { %207 = vmatpush3.bf16.msra.mxu0 %v206_v5  ;;  %v215_v13 = vpack.c.bf16 %v49_v12, %v48_v11  ;;  %v218_v16 = vpack.c.bf16 %v51_v15, %v50_v14  ;;  %v52_v17 = vld [vmem:[#allocation5 + $0x50] sm:$0xff]  ;;  %v53_v18 = vld [vmem:[#allocation5 + $0x58] sm:$0xff]  ;;  %v54_v20 = vld [vmem:[#allocation5 + $0x60] sm:$0xff]  ;;  %p282_p2 = scmp.ne.s32.totalorder %s143_s12, %s281_s13  ;;  %p287_p4 = scmp.lt.s32.totalorder %s281_s13, %s281_s13 }
  0x2b   :  { %208 = vmatprep.subr.bf16.mxu0 %v313_v0  ;;  %v221_v19 = vpack.c.bf16 %v53_v18, %v52_v17  ;;  %v55_v21 = vld [vmem:[#allocation5 + $0x68] sm:$0xff]  ;;  %v56_v23 = vld [vmem:[#allocation5 + $0x70] sm:$0xff]  ;;  %v57_v24 = vld [vmem:[#allocation5 + $0x78] sm:$0xff] }
  0x2c   :  { %v224_v22 = vpack.c.bf16 %v55_v21, %v54_v20  ;;  %v227_v25 = vpack.c.bf16 %v57_v24, %v56_v23  ;;  %v41_v26 = vld [vmem:[#allocation2] sm:$0xff]  ;;  %p288_p5 = por %p287_p4, %p286_p3 }
  0x2d   :  { %v152_v27 = vld [vmem:[%s385_s2] ss:$0 sm:$0xff] }
  0x2e   :  { %210 = vmatpush3.bf16.msra.mxu0 %v209_v7  ;;  %p289_p6 = pnand %p288_p5, %p282_p2 }
  0x2f   :  { %211 = vmatprep.subr.bf16.mxu0 %v313_v0 }
  0x32   :  { %213 = vmatpush3.bf16.msra.mxu0 %v212_v10 }
  0x33   :  { %214 = vmatprep.subr.bf16.mxu0 %v313_v0 }
  0x36   :  { %216 = vmatpush3.bf16.msra.mxu0 %v215_v13 }
  0x37   :  { %217 = vmatprep.subr.bf16.mxu0 %v313_v0 }
  0x3a   :  { %219 = vmatpush3.bf16.msra.mxu0 %v218_v16 }
  0x3b   :  { %220 = vmatprep.subr.bf16.mxu0 %v313_v0 }
  0x3e   :  { %222 = vmatpush3.bf16.msra.mxu0 %v221_v19 }
  0x3f   :  { %223 = vmatprep.subr.bf16.mxu0 %v313_v0 }
  0x42   :  { %225 = vmatpush3.bf16.msra.mxu0 %v224_v22 }
  0x43   :  { %226 = vmatprep.subr.bf16.mxu0 %v313_v0 }
  0x46   :  { %228 = vmatpush3.bf16.msra.mxu0 %v227_v25 }
  0x49   :  { %203 = vmatmul.mubr.f32.vlgmr.msra.gmra.mrb[0].mxu0 %v41_v26 }
 0x11c   :  { %v131_v28 = vpop.f32.mrb[0].mxu0 }
 0x11d   :  { %v132_v29 = vadd.f32 %v152_v27, %v131_v28  ;;  %v204_v30 = vpop.f32.mrb[1].mxu0 }
 0x11f   :  { %135 = vst [vmem:[#allocation7] sm:$0xff] %v132_v29 }
 0x120   :  { %292 = shalt.err (!%p289_p6)
}
 0x121   :  { %s293_s16 = scalar_lea.hbm %s386_s3, 128 }
 0x122   :  { %p294_p7 = scmp.ne.s32.totalorder %s386_s3, %s293_s16  ;;  %p297_p8 = scmp.lt.u32.totalorder %s293_s16, %s386_s3 }
 0x124   :  { %p299_p9 = pnand %p297_p8, %p294_p7 }
 0x126   :  { %302 = shalt.err (!%p299_p9)
}
 0x127   :  { %145 = dma.vmem_to_hbm [thread:$0]  %s143_s12, 128, %s386_s3, [#allocation4]  }
 0x128   :  { %307 = dma.done.wait [#allocation4], 128  }
 0x129   :  { %308 = vsyncadd [#allocation4], 4294967168 }
 0x12a   :  { %149 = vsyncpa [#allocation3], 1 }
 0x12b   :  { %150 = vsyncpa [#allocation6], 1 }
 0x12c   :  { %151 = vsyncpa [#allocation4], 1 }

</bundles_post_ra>
